<compile_context>
chip_gen: v7x
topology: tpu7x:2x2x1
jax: 0.10.0
libtpu: 0.0.40
codegen_flags: <defaults>
</compile_context>

<pallas_src>
import functools

import jax
import jax.numpy as jnp
from jax.experimental import pallas as pl
from jax.experimental.pallas import tpu as pltpu


def _round_up(x, m):
    return ((x + m - 1) // m) * m


def _silu(x, approx):
    # x * sigmoid(x); reciprocal routed to the EUP slot (approx when allowed).
    return x * pl.reciprocal(1.0 + jnp.exp(-x), approx=approx)


def actor_kernel(x_ref, w1_ref, w234_ref, b14_ref, w5_ref, b5_ref, out_ref, *,
                 approx):
    """One batch tile of the 5-layer MLP; activations stay in vregs."""
    cdt = w1_ref.dtype  # matmul operand dtype (f32 or bf16); accumulate in f32

    # Layer 1: Linear(obs -> hid) + SiLU (bias add + SiLU in f32)
    h = jnp.dot(x_ref[...], w1_ref[...], preferred_element_type=jnp.float32)
    h = _silu(h + b14_ref[0], approx)

    # Layers 2-4: Linear(hid -> hid) + SiLU
    for k in range(3):
        h = jnp.dot(h.astype(cdt), w234_ref[k],
                    preferred_element_type=jnp.float32)
        h = _silu(h + b14_ref[k + 1], approx)

    # Layer 5: Linear(hid -> act), no activation.
    y = jnp.dot(h.astype(cdt), w5_ref[...],
                preferred_element_type=jnp.float32) + b5_ref[...]
    out_ref[...] = y.astype(out_ref.dtype)


def prepare_actor_params(params, *, use_bf16=False):
    """One-time packing of weights/biases into the kernel operand layout.

    params: list of 5 (W[in,out], b[1,out]) f32 pairs.
    Returns a dict reused across forward calls (no per-call padding/copies).
    """
    cdt = jnp.dtype(jnp.bfloat16) if use_bf16 else jnp.dtype(jnp.float32)
    hid_dim = params[0][0].shape[1]
    w1 = params[0][0].astype(cdt)                                   # (obs, hid)
    w234 = jnp.stack([params[i][0] for i in (1, 2, 3)]).astype(cdt)  # (3, hid, hid)
    b14 = jnp.stack([params[i][1].reshape(1, hid_dim)
                     for i in range(4)]).astype(jnp.float32)        # (4, 1, hid)
    w5 = params[4][0].astype(cdt)                                   # (hid, act)
    b5 = params[4][1].reshape(1, -1).astype(jnp.float32)            # (1, act)
    return dict(w1=w1, w234=w234, b14=b14, w5=w5, b5=b5, compute_dtype=cdt)


def _vmem_cap_bytes():
    try:
        info = pltpu.get_tpu_info()
        cap = getattr(info, "vmem_capacity_bytes", None)
        if cap:
            return int(cap)
    except Exception:
        pass
    return 64 << 20  # conservative fallback (v7x physical VMEM per TC)


def actor_forward(x, prep, *, tile_b=256, approx_silu=True):
    """x: [batch, obs_dim] f32; prep: output of prepare_actor_params()."""
    batch, obs_dim = x.shape
    cdt = prep["compute_dtype"]
    hid_dim = prep["w1"].shape[1]
    act_dim = prep["w5"].shape[1]
    wbytes = cdt.itemsize

    # bf16 packs two rows per sublane -> 16-row granularity; f32 -> 8.
    gran = 16 if wbytes == 2 else 8
    # Aim for >=2 grid steps when batch allows (v7x dual-TC sharding of the
    # "parallel" batch axis), capped by the requested tile size.
    tile_b = max(gran, min(_round_up(tile_b, gran),
                           _round_up(pl.cdiv(batch, 2), gran)))
    batch_p = _round_up(batch, tile_b)
    grid = (batch_p // tile_b,)

    # Only x needs per-call work: dtype cast + (rare) batch padding.
    x_c = x.astype(cdt)
    if batch_p != batch:
        x_c = jnp.pad(x_c, ((0, batch_p - batch), (0, 0)))

    # Full-array blocks with constant index maps: weights/biases stay resident
    # in VMEM across batch tiles; exempt from the (8,128) divisibility rule.
    in_specs = [
        pl.BlockSpec((tile_b, obs_dim), lambda i: (i, 0)),
        pl.BlockSpec(prep["w1"].shape, lambda i: (0, 0)),
        pl.BlockSpec(prep["w234"].shape, lambda i: (0, 0, 0)),
        pl.BlockSpec(prep["b14"].shape, lambda i: (0, 0, 0)),
        pl.BlockSpec(prep["w5"].shape, lambda i: (0, 0)),
        pl.BlockSpec(prep["b5"].shape, lambda i: (0, 0)),
    ]
    out_specs = pl.BlockSpec((tile_b, act_dim), lambda i: (i, 0))

    # VMEM budget: double-buffered x/out tiles + (conservatively doubled)
    # resident weights/biases; cap at 3/4 of this generation's physical VMEM.
    w_elems = obs_dim * hid_dim + 3 * hid_dim * hid_dim + hid_dim * act_dim
    b_elems = 4 * hid_dim + act_dim
    est = (2 * tile_b * obs_dim * wbytes
           + 2 * tile_b * act_dim * 4
           + 2 * w_elems * wbytes
           + 2 * b_elems * 4)
    vmem_limit = int(min(max(4 * est, 32 << 20), (_vmem_cap_bytes() * 3) // 4))

    out_padded = pl.pallas_call(
        functools.partial(actor_kernel, approx=approx_silu),
        out_shape=jax.ShapeDtypeStruct((batch_p, act_dim), jnp.float32),
        grid=grid,
        in_specs=in_specs,
        out_specs=out_specs,
        compiler_params=pltpu.CompilerParams(
            dimension_semantics=("parallel",),
            vmem_limit_bytes=vmem_limit),
    )(x_c, prep["w1"], prep["w234"], prep["b14"], prep["w5"], prep["b5"])

    return out_padded[:batch] if batch_p != batch else out_padded


def init_params(key, obs_dim, hid_dim, act_dim):
    """Deterministic init mimicking nn.Linear default (uniform +/- 1/sqrt(in))."""
    dims = [(obs_dim, hid_dim), (hid_dim, hid_dim), (hid_dim, hid_dim),
            (hid_dim, hid_dim), (hid_dim, act_dim)]
    params = []
    for (din, dout) in dims:
        key, kw, kb = jax.random.split(key, 3)
        bound = 1.0 / jnp.sqrt(jnp.float32(din))
        w = jax.random.uniform(kw, (din, dout), jnp.float32, -bound, bound)
        b = jax.random.uniform(kb, (1, dout), jnp.float32, -bound, bound)
        params.append((w, b))
    return params


def actor_forward_ref(x, params):
    """Pure-JAX reference of the same forward pass."""
    h = x
    for i, (w, b) in enumerate(params):
        h = h @ w + b
        if i < len(params) - 1:
            h = h * jax.nn.sigmoid(h)
    return h


if __name__ == "__main__":
    obs_dim, hid_dim, act_dim = 16, 32, 8
    batch = 8

    key = jax.random.PRNGKey(0)
    key, kx = jax.random.split(key)
    x = jax.random.normal(kx, (batch, obs_dim), jnp.float32)
    params = init_params(key, obs_dim, hid_dim, act_dim)

    ref = actor_forward_ref(x, params)

    # f32 operands, exact reciprocal in SiLU: strict check vs reference.
    prep_f32 = prepare_actor_params(params, use_bf16=False)
    out = jax.block_until_ready(actor_forward(x, prep_f32, approx_silu=False))
    assert out.shape == (batch, act_dim)
    assert jnp.allclose(out, ref, atol=1e-4, rtol=1e-4), "f32 mismatch vs reference"

    # f32 operands, EUP-approximate reciprocal in SiLU (default fast path).
    out_approx = jax.block_until_ready(actor_forward(x, prep_f32))
    assert jnp.allclose(out_approx, ref, atol=1e-2, rtol=1e-2), "approx-SiLU mismatch"

    # bf16 matmul operands / f32 accumulation (native MXU dtype on v6e/v7x).
    prep_bf16 = prepare_actor_params(params, use_bf16=True)
    out_bf16 = jax.block_until_ready(actor_forward(x, prep_bf16))
    assert out_bf16.shape == (batch, act_dim)
    assert jnp.allclose(out_bf16, ref, atol=5e-2, rtol=5e-2), "bf16 mismatch vs reference"

    print("KERNEL_OK")
</pallas_src>

<mosaic_0001>
module attributes {stable_mosaic.version = 11 : i64} {
  func.func @actor_kernel(%arg0: i32, %arg1: memref<8x16xf32, #tpu.memory_space<vmem>>, %arg2: memref<16x32xf32, #tpu.memory_space<vmem>>, %arg3: memref<3x32x32xf32, #tpu.memory_space<vmem>>, %arg4: memref<4x1x32xf32, #tpu.memory_space<vmem>>, %arg5: memref<32x8xf32, #tpu.memory_space<vmem>>, %arg6: memref<1x8xf32, #tpu.memory_space<vmem>>, %arg7: memref<8x8xf32, #tpu.memory_space<vmem>>) attributes {dimension_semantics = [#tpu.dimension_semantics<parallel>], iteration_bounds = array<i64: 1>, scalar_prefetch = 0 : i64, scratch_operands = 0 : i64, tpu.core_type = #tpu.core_type<tc>, window_params = [{transform_indices = @transform_0, window_bounds = array<i64: 8, 16>}, {pipeline_mode = #tpu.pipeline_mode<synchronous>, transform_indices = @transform_1, window_bounds = array<i64: 16, 32>}, {pipeline_mode = #tpu.pipeline_mode<synchronous>, transform_indices = @transform_2, window_bounds = array<i64: 3, 32, 32>}, {pipeline_mode = #tpu.pipeline_mode<synchronous>, transform_indices = @transform_3, window_bounds = array<i64: 4, 1, 32>}, {pipeline_mode = #tpu.pipeline_mode<synchronous>, transform_indices = @transform_4, window_bounds = array<i64: 32, 8>}, {pipeline_mode = #tpu.pipeline_mode<synchronous>, transform_indices = @transform_5, window_bounds = array<i64: 1, 8>}, {transform_indices = @transform_6, window_bounds = array<i64: 8, 8>}]} {
    %c0 = arith.constant 0 : index
    %c0_0 = arith.constant 0 : index
    %0 = vector.load %arg1[%c0, %c0_0] : memref<8x16xf32, #tpu.memory_space<vmem>>, vector<8x16xf32>
    %c0_1 = arith.constant 0 : index
    %c0_2 = arith.constant 0 : index
    %1 = vector.load %arg2[%c0_1, %c0_2] : memref<16x32xf32, #tpu.memory_space<vmem>>, vector<16x32xf32>
    %cst = arith.constant dense<0.000000e+00> : vector<8x32xf32>
    %2 = tpu.matmul %0, %1, %cst {dimension_numbers = #tpu.dot_dimension_numbers<[1], [0], [0], [1], [0, 0, 1, 1], [], []>} : vector<8x16xf32>, vector<16x32xf32>, vector<8x32xf32> -> vector<8x32xf32>
    %c0_3 = arith.constant 0 : index
    %c0_4 = arith.constant 0 : index
    %c0_5 = arith.constant 0 : index
    %3 = vector.load %arg4[%c0_3, %c0_4, %c0_5] : memref<4x1x32xf32, #tpu.memory_space<vmem>>, vector<1x1x32xf32>
    %4 = vector.shape_cast %3 : vector<1x1x32xf32> to vector<1x32xf32>
    %5 = vector.broadcast %4 : vector<1x32xf32> to vector<8x32xf32>
    %6 = arith.addf %2, %5 : vector<8x32xf32>
    %cst_6 = arith.constant 0.000000e+00 : f32
    %7 = vector.broadcast %cst_6 : f32 to vector<8x32xf32>
    %8 = arith.subf %7, %6 : vector<8x32xf32>
    %9 = math.exp %8 : vector<8x32xf32>
    %cst_7 = arith.constant 1.000000e+00 : f32
    %10 = vector.broadcast %cst_7 : f32 to vector<8x32xf32>
    %11 = arith.addf %10, %9 : vector<8x32xf32>
    %12 = tpu.reciprocal %11 : vector<8x32xf32> -> vector<8x32xf32>
    %13 = arith.mulf %6, %12 : vector<8x32xf32>
    %c0_8 = arith.constant 0 : index
    %c0_9 = arith.constant 0 : index
    %c0_10 = arith.constant 0 : index
    %14 = vector.load %arg3[%c0_8, %c0_9, %c0_10] : memref<3x32x32xf32, #tpu.memory_space<vmem>>, vector<1x32x32xf32>
    %15 = vector.shape_cast %14 : vector<1x32x32xf32> to vector<32x32xf32>
    %cst_11 = arith.constant dense<0.000000e+00> : vector<8x32xf32>
    %16 = tpu.matmul %13, %15, %cst_11 {dimension_numbers = #tpu.dot_dimension_numbers<[1], [0], [0], [1], [0, 0, 1, 1], [], []>} : vector<8x32xf32>, vector<32x32xf32>, vector<8x32xf32> -> vector<8x32xf32>
    %c1 = arith.constant 1 : index
    %c0_12 = arith.constant 0 : index
    %c0_13 = arith.constant 0 : index
    %17 = vector.load %arg4[%c1, %c0_12, %c0_13] : memref<4x1x32xf32, #tpu.memory_space<vmem>>, vector<1x1x32xf32>
    %18 = vector.shape_cast %17 : vector<1x1x32xf32> to vector<1x32xf32>
    %19 = vector.broadcast %18 : vector<1x32xf32> to vector<8x32xf32>
    %20 = arith.addf %16, %19 : vector<8x32xf32>
    %cst_14 = arith.constant 0.000000e+00 : f32
    %21 = vector.broadcast %cst_14 : f32 to vector<8x32xf32>
    %22 = arith.subf %21, %20 : vector<8x32xf32>
    %23 = math.exp %22 : vector<8x32xf32>
    %cst_15 = arith.constant 1.000000e+00 : f32
    %24 = vector.broadcast %cst_15 : f32 to vector<8x32xf32>
    %25 = arith.addf %24, %23 : vector<8x32xf32>
    %26 = tpu.reciprocal %25 : vector<8x32xf32> -> vector<8x32xf32>
    %27 = arith.mulf %20, %26 : vector<8x32xf32>
    %c1_16 = arith.constant 1 : index
    %c0_17 = arith.constant 0 : index
    %c0_18 = arith.constant 0 : index
    %28 = vector.load %arg3[%c1_16, %c0_17, %c0_18] : memref<3x32x32xf32, #tpu.memory_space<vmem>>, vector<1x32x32xf32>
    %29 = vector.shape_cast %28 : vector<1x32x32xf32> to vector<32x32xf32>
    %cst_19 = arith.constant dense<0.000000e+00> : vector<8x32xf32>
    %30 = tpu.matmul %27, %29, %cst_19 {dimension_numbers = #tpu.dot_dimension_numbers<[1], [0], [0], [1], [0, 0, 1, 1], [], []>} : vector<8x32xf32>, vector<32x32xf32>, vector<8x32xf32> -> vector<8x32xf32>
    %c2 = arith.constant 2 : index
    %c0_20 = arith.constant 0 : index
    %c0_21 = arith.constant 0 : index
    %31 = vector.load %arg4[%c2, %c0_20, %c0_21] : memref<4x1x32xf32, #tpu.memory_space<vmem>>, vector<1x1x32xf32>
    %32 = vector.shape_cast %31 : vector<1x1x32xf32> to vector<1x32xf32>
    %33 = vector.broadcast %32 : vector<1x32xf32> to vector<8x32xf32>
    %34 = arith.addf %30, %33 : vector<8x32xf32>
    %cst_22 = arith.constant 0.000000e+00 : f32
    %35 = vector.broadcast %cst_22 : f32 to vector<8x32xf32>
    %36 = arith.subf %35, %34 : vector<8x32xf32>
    %37 = math.exp %36 : vector<8x32xf32>
    %cst_23 = arith.constant 1.000000e+00 : f32
    %38 = vector.broadcast %cst_23 : f32 to vector<8x32xf32>
    %39 = arith.addf %38, %37 : vector<8x32xf32>
    %40 = tpu.reciprocal %39 : vector<8x32xf32> -> vector<8x32xf32>
    %41 = arith.mulf %34, %40 : vector<8x32xf32>
    %c2_24 = arith.constant 2 : index
    %c0_25 = arith.constant 0 : index
    %c0_26 = arith.constant 0 : index
    %42 = vector.load %arg3[%c2_24, %c0_25, %c0_26] : memref<3x32x32xf32, #tpu.memory_space<vmem>>, vector<1x32x32xf32>
    %43 = vector.shape_cast %42 : vector<1x32x32xf32> to vector<32x32xf32>
    %cst_27 = arith.constant dense<0.000000e+00> : vector<8x32xf32>
    %44 = tpu.matmul %41, %43, %cst_27 {dimension_numbers = #tpu.dot_dimension_numbers<[1], [0], [0], [1], [0, 0, 1, 1], [], []>} : vector<8x32xf32>, vector<32x32xf32>, vector<8x32xf32> -> vector<8x32xf32>
    %c3 = arith.constant 3 : index
    %c0_28 = arith.constant 0 : index
    %c0_29 = arith.constant 0 : index
    %45 = vector.load %arg4[%c3, %c0_28, %c0_29] : memref<4x1x32xf32, #tpu.memory_space<vmem>>, vector<1x1x32xf32>
    %46 = vector.shape_cast %45 : vector<1x1x32xf32> to vector<1x32xf32>
    %47 = vector.broadcast %46 : vector<1x32xf32> to vector<8x32xf32>
    %48 = arith.addf %44, %47 : vector<8x32xf32>
    %cst_30 = arith.constant 0.000000e+00 : f32
    %49 = vector.broadcast %cst_30 : f32 to vector<8x32xf32>
    %50 = arith.subf %49, %48 : vector<8x32xf32>
    %51 = math.exp %50 : vector<8x32xf32>
    %cst_31 = arith.constant 1.000000e+00 : f32
    %52 = vector.broadcast %cst_31 : f32 to vector<8x32xf32>
    %53 = arith.addf %52, %51 : vector<8x32xf32>
    %54 = tpu.reciprocal %53 : vector<8x32xf32> -> vector<8x32xf32>
    %55 = arith.mulf %48, %54 : vector<8x32xf32>
    %c0_32 = arith.constant 0 : index
    %c0_33 = arith.constant 0 : index
    %56 = vector.load %arg5[%c0_32, %c0_33] : memref<32x8xf32, #tpu.memory_space<vmem>>, vector<32x8xf32>
    %cst_34 = arith.constant dense<0.000000e+00> : vector<8x8xf32>
    %57 = tpu.matmul %55, %56, %cst_34 {dimension_numbers = #tpu.dot_dimension_numbers<[1], [0], [0], [1], [0, 0, 1, 1], [], []>} : vector<8x32xf32>, vector<32x8xf32>, vector<8x8xf32> -> vector<8x8xf32>
    %c0_35 = arith.constant 0 : index
    %c0_36 = arith.constant 0 : index
    %58 = vector.load %arg6[%c0_35, %c0_36] : memref<1x8xf32, #tpu.memory_space<vmem>>, vector<1x8xf32>
    %59 = vector.broadcast %58 : vector<1x8xf32> to vector<8x8xf32>
    %60 = arith.addf %57, %59 : vector<8x8xf32>
    %c0_37 = arith.constant 0 : index
    %c0_38 = arith.constant 0 : index
    %61 = vector.load %arg7[%c0_37, %c0_38] : memref<8x8xf32, #tpu.memory_space<vmem>>, vector<8x8xf32>
    tpu.vector_store %arg7[%c0_37, %c0_38], %60 {strides = array<i32>} : memref<8x8xf32, #tpu.memory_space<vmem>>, vector<8x8xf32>,
    return
  }
  func.func @transform_0(%arg0: i32) -> (i32, i32) {
    %c0_i32 = arith.constant 0 : i32
    %c0_i32_0 = arith.constant 0 : i32
    return %arg0, %c0_i32 : i32, i32
  }
  func.func @transform_1(%arg0: i32) -> (i32, i32) {
    %c0_i32 = arith.constant 0 : i32
    %c0_i32_0 = arith.constant 0 : i32
    %c0_i32_1 = arith.constant 0 : i32
    return %c0_i32, %c0_i32_0 : i32, i32
  }
  func.func @transform_2(%arg0: i32) -> (i32, i32, i32) {
    %c0_i32 = arith.constant 0 : i32
    %c0_i32_0 = arith.constant 0 : i32
    %c0_i32_1 = arith.constant 0 : i32
    %c0_i32_2 = arith.constant 0 : i32
    return %c0_i32, %c0_i32_0, %c0_i32_1 : i32, i32, i32
  }
  func.func @transform_3(%arg0: i32) -> (i32, i32, i32) {
    %c0_i32 = arith.constant 0 : i32
    %c0_i32_0 = arith.constant 0 : i32
    %c0_i32_1 = arith.constant 0 : i32
    %c0_i32_2 = arith.constant 0 : i32
    return %c0_i32, %c0_i32_0, %c0_i32_1 : i32, i32, i32
  }
  func.func @transform_4(%arg0: i32) -> (i32, i32) {
    %c0_i32 = arith.constant 0 : i32
    %c0_i32_0 = arith.constant 0 : i32
    %c0_i32_1 = arith.constant 0 : i32
    return %c0_i32, %c0_i32_0 : i32, i32
  }
  func.func @transform_5(%arg0: i32) -> (i32, i32) {
    %c0_i32 = arith.constant 0 : i32
    %c0_i32_0 = arith.constant 0 : i32
    %c0_i32_1 = arith.constant 0 : i32
    return %c0_i32, %c0_i32_0 : i32, i32
  }
  func.func @transform_6(%arg0: i32) -> (i32, i32) {
    %c0_i32 = arith.constant 0 : i32
    %c0_i32_0 = arith.constant 0 : i32
    return %arg0, %c0_i32 : i32, i32
  }
}

</mosaic_0001>

<bundles_post_ra>
// kernel: tpu_custom_call.1
= control target key start
LH: loop header
LB: loop body
LE: loop exit
PB: predicated region body
PF: predicated region fallthrough
CT: control target
= control target key end

     0   :  { %11 = vsyncpa [#allocation3], 0  ;;  %s810_s0 = inlined_call_operand.vmem [shape: f32[8,16], index: 0, kind: input, shape index: {}]   ;;  %s811_s1 = inlined_call_operand.vmem [shape: f32[16,32], index: 1, kind: input, shape index: {}]   ;;  %s812_s2 = inlined_call_operand.hbm [shape: f32[3,32,32], index: 2, kind: input, shape index: {}]   ;;  %s813_s3 = inlined_call_operand.vmem [shape: f32[4,1,32], index: 3, kind: input, shape index: {}]   ;;  %s814_s4 = inlined_call_operand.vmem [shape: f32[32,8], index: 4, kind: input, shape index: {}]   ;;  %s815_s5 = inlined_call_operand.vmem [shape: f32[1,8], index: 5, kind: input, shape index: {}]   ;;  %s816_s6 = inlined_call_operand.hbm [shape: f32[8,8], index: 6, kind: output, shape index: {}]  }
   0x1   :  { %12 = vsyncpa [#allocation4], 0  ;;  %s690_s21 = smov [#allocation2]   ;;  %s642_s25 = scalar_lea.hbm %s812_s2, 1536 }
   0x2   :  { %s22_s22 = sshll.u32 %s690_s21, 4  ;;  %p643_p0 = scmp.ne.s32.totalorder %s812_s2, %s642_s25  ;;  %s23_s22 = int_to_ptr.vmem [resolvable:$true] %s22_s22 }
   0x3   :  { %p646_p1 = scmp.lt.u32.totalorder %s642_s25, %s812_s2 }
   0x5   :  { %p648_p2 = pnand %p646_p1, %p643_p0 }
   0x7   :  { %651 = shalt.err (!%p648_p2)
}
   0x8   :  { %s652_s30 = scalar_lea.vmem %s23_s22, 1536  ;;  %p657_p4 = scmp.lt.s32.totalorder %s23_s22, %s23_s22 }
   0x9   :  { %p653_p3 = scmp.ne.s32.totalorder %s23_s22, %s652_s30  ;;  %p658_p5 = scmp.lt.s32.totalorder %s652_s30, %s652_s30 }
   0xb   :  { %p659_p6 = por %p658_p5, %p657_p4 }
   0xd   :  { %p660_p7 = pnand %p659_p6, %p653_p3 }
   0xf   :  { %663 = shalt.err (!%p660_p7)
}
  0x10   :  { %s691_s7 = smov 128   ;;  %s692_s8 = smov 8  }
  0x11   :  { %28 = dma.hbm_to_vmem [thread:$0]  %s812_s2, 1536, %s23_s22, [#allocation3], %s691_s7, %s691_s7, %s692_s8  }
  0x12   :  { %686 = dma.done.wait [#allocation3], 1536  }
  0x13   :  { %687 = vsyncadd [#allocation3], 4294965760  ;;  %v693_v0 = vmov 0.0|0.0   ;;  %vm694_vm0 = vmmov 0   ;;  %v695_v1 = vmov 0.0   ;;  %v39_v2 = vld [vmem:[%s811_s1] sm:$0xff] }
  0x14   :  { %592 = vmatprep.subr.bf16.mxu0 %v693_v0  ;;  %545 = vmatprep.mubr.msk.f32.mxu0 %vm694_vm0, %v695_v1  ;;  %v40_v3 = vld [vmem:[%s811_s1 + $0x8] sm:$0xff]  ;;  %v38_v5 = vld [vmem:[%s810_s0] sm:$0xff]  ;;  %vm48_vm1 = vcmask 130048   ;;  %v130_v9 = vld [vmem:[#allocation2 + $0x10] sm:$0xff]  ;;  %vm140_vm2 = vcmask 261120   ;;  %s696_s7 = smov [#allocation5]  }
  0x15   :  { %595 = vmatprep.subr.bf16.mxu1 %v693_v0  ;;  %556 = vmatprep.mubr.msk.f32.mxu1 %vm694_vm0, %v695_v1  ;;  %v593_v4 = vpack.c.bf16 %v40_v3, %v39_v2  ;;  %v128_v6 = vld [vmem:[#allocation2] sm:$0xff]  ;;  %v129_v7 = vld [vmem:[#allocation2 + $0x8] sm:$0xff]  ;;  %v131_v10 = vld [vmem:[#allocation2 + $0x18] sm:$0xff]  ;;  %s496_s8 = sshll.u32 %s696_s7, 4  ;;  %vm488_vm3 = vcmask 64512   ;;  %s497_s8 = int_to_ptr.vmem [resolvable:$true] %s496_s8 }
  0x16   :  { %v596_v8 = vpack.c.bf16 %v129_v7, %v128_v6  ;;  %v599_v11 = vpack.c.bf16 %v131_v10, %v130_v9  ;;  %v505_v12 = vld [vmem:[%s813_s3] ss:$0 sm:$0xff]  ;;  %v222_v23 = vld [vmem:[#allocation2 + $0x28] sm:$0xff]  ;;  %v223_v25 = vld [vmem:[#allocation2 + $0x30] sm:$0xff]  ;;  %p669_p9 = scmp.lt.s32.totalorder %s497_s8, %s497_s8 }
  0x17   :  { %594 = vmatpush3.bf16.msra.mxu0 %v593_v4  ;;  %v221_v22 = vld [vmem:[#allocation2 + $0x20] sm:$0xff]  ;;  %v224_v26 = vld [vmem:[#allocation2 + $0x38] sm:$0xff]  ;;  %v314_v39 = vld [vmem:[#allocation2 + $0x48] sm:$0xff] }
  0x18   :  { %601 = vmatprep.subr.bf16.mxu0 %v693_v0  ;;  %597 = vmatpush3.bf16.msra.mxu1 %v596_v8  ;;  %v602_v24 = vpack.c.bf16 %v222_v23, %v221_v22  ;;  %v605_v27 = vpack.c.bf16 %v224_v26, %v223_v25  ;;  %v508_v28 = vld [vmem:[%s813_s3 + $0x1] ss:$0 sm:$0xff]  ;;  %v315_v41 = vld [vmem:[#allocation2 + $0x50] sm:$0xff]  ;;  %v316_v42 = vld [vmem:[#allocation2 + $0x58] sm:$0xff] }
  0x19   :  { %598 = vmatprep.subr.bf16.mxu1 %v693_v0  ;;  %v313_v38 = vld [vmem:[#allocation2 + $0x40] sm:$0xff]  ;;  %v611_v43 = vpack.c.bf16 %v316_v42, %v315_v41  ;;  %v405_v55 = vld [vmem:[%s814_s4 + $0x8] sm:$0xff]  ;;  %v406_v57 = vld [vmem:[%s814_s4 + $0x10] sm:$0xff] }
  0x1a   :  { %546 = vmatmul.mubr.msk.f32.vlgmr.msra.gmra.mrb[0].mxu0 %vm48_vm1, %v38_v5  ;;  %v608_v40 = vpack.c.bf16 %v314_v39, %v313_v38  ;;  %v511_v44 = vld [vmem:[%s813_s3 + $0x2] ss:$0 sm:$0xff]  ;;  %v407_v58 = vld [vmem:[%s814_s4 + $0x18] sm:$0xff]  ;;  %v514_v60 = vld [vmem:[%s813_s3 + $0x3] ss:$0 sm:$0xff]  ;;  %s664_s3 = scalar_lea.vmem %s497_s8, 128 }
  0x1b   :  { %567 = vmatprep.mubr.msk.f32.mxu0 %vm694_vm0, %v695_v1  ;;  %603 = vmatpush3.bf16.msra.mxu0 %v602_v24  ;;  %v404_v54 = vld [vmem:[%s814_s4] sm:$0xff]  ;;  %v617_v59 = vpack.c.bf16 %v407_v58, %v406_v57  ;;  %p665_p8 = scmp.ne.s32.totalorder %s497_s8, %s664_s3  ;;  %p670_p10 = scmp.lt.s32.totalorder %s664_s3, %s664_s3 }
  0x1c   :  { %600 = vmatpush3.bf16.msra.mxu1 %v599_v11  ;;  %604 = vmatprep.subr.bf16.mxu0 %v693_v0  ;;  %v614_v56 = vpack.c.bf16 %v405_v55, %v404_v54  ;;  %v516_v6 = vld [vmem:[%s815_s5] ss:$0 sm:$0xff] }
  0x1d   :  { %607 = vmatprep.subr.bf16.mxu1 %v693_v0  ;;  %p671_p11 = por %p670_p10, %p669_p9 }
  0x1f   :  { %606 = vmatpush3.bf16.msra.mxu0 %v605_v27  ;;  %p672_p12 = pnand %p671_p11, %p665_p8 }
  0x20   :  { %613 = vmatprep.subr.bf16.mxu0 %v693_v0 }
  0xed   :  { %v118_v13 = vpop.f32.mrb[0].mxu0 }
  0xee   :  { %v119_v14 = vadd.f32 %v505_v12, %v118_v13  ;;  %v547_v15 = vpop.f32.mrb[1].mxu0 }
  0xf0   :  { %v122_v16 = vsub.f32 0.0, %v119_v14 }
  0xf2   :  { %v123_v17 = vmul.f32 1.442695, %v122_v16 }
  0xf4   :  { %626 = vpow2.f32 %v123_v17 }
  0xfe   :  { %v627_v18 = vpop.eup %626 }
  0xff   :  { %v125_v19 = vadd.f32 1.0, %v627_v18 }
 0x101   :  { %628 = vrcp.f32 %v125_v19 }
 0x10b   :  { %v629_v20 = vpop.eup %628 }
 0x10c   :  { %v127_v21 = vmul.f32 %v629_v20, %v119_v14 }
 0x10e   :  { %557 = vmatmul.mubr.msk.f32.vlgmr.msra.gmra.mrb[0].mxu1 %vm140_vm2, %v127_v21 }
 0x10f   :  { %578 = vmatprep.mubr.msk.f32.mxu1 %vm694_vm0, %v695_v1  ;;  %609 = vmatpush3.bf16.msra.mxu1 %v608_v40 }
 0x110   :  { %610 = vmatprep.subr.bf16.mxu1 %v693_v0 }
 0x113   :  { %612 = vmatpush3.bf16.msra.mxu1 %v611_v43 }
 0x1e1   :  { %v210_v29 = vpop.f32.mrb[0].mxu1 }
 0x1e2   :  { %v211_v30 = vadd.f32 %v508_v28, %v210_v29  ;;  %v558_v31 = vpop.f32.mrb[1].mxu1 }
 0x1e4   :  { %v214_v32 = vsub.f32 0.0, %v211_v30 }
 0x1e6   :  { %v215_v33 = vmul.f32 1.442695, %v214_v32 }
 0x1e8   :  { %630 = vpow2.f32 %v215_v33 }
 0x1f2   :  { %v631_v34 = vpop.eup %630 }
 0x1f3   :  { %v217_v35 = vadd.f32 1.0, %v631_v34 }
 0x1f5   :  { %632 = vrcp.f32 %v217_v35 }
 0x1ff   :  { %v633_v36 = vpop.eup %632 }
 0x200   :  { %v219_v37 = vmul.f32 %v633_v36, %v211_v30 }
 0x202   :  { %568 = vmatmul.mubr.msk.f32.vlgmr.msra.gmra.mrb[2].mxu0 %vm140_vm2, %v219_v37 }
 0x203   :  { %589 = vmatprep.mubr.msk.f32.mxu0 %vm694_vm0, %v695_v1  ;;  %615 = vmatpush3.bf16.msra.mxu0 %v614_v56 }
 0x204   :  { %616 = vmatprep.subr.bf16.mxu0 %v693_v0 }
 0x207   :  { %618 = vmatpush3.bf16.msra.mxu0 %v617_v59 }
 0x2d5   :  { %v302_v45 = vpop.f32.mrb[2].mxu0 }
 0x2d6   :  { %v303_v46 = vadd.f32 %v511_v44, %v302_v45  ;;  %v569_v47 = vpop.f32.mrb[3].mxu0 }
 0x2d8   :  { %v306_v48 = vsub.f32 0.0, %v303_v46 }
 0x2da   :  { %v307_v49 = vmul.f32 1.442695, %v306_v48 }
 0x2dc   :  { %634 = vpow2.f32 %v307_v49 }
 0x2e6   :  { %v635_v50 = vpop.eup %634 }
 0x2e7   :  { %v309_v51 = vadd.f32 1.0, %v635_v50 }
 0x2e9   :  { %636 = vrcp.f32 %v309_v51 }
 0x2f3   :  { %v637_v52 = vpop.eup %636 }
 0x2f4   :  { %v311_v53 = vmul.f32 %v637_v52, %v303_v46 }
 0x2f6   :  { %579 = vmatmul.mubr.msk.f32.vlgmr.msra.gmra.mrb[2].mxu1 %vm140_vm2, %v311_v53 }
 0x3c9   :  { %v394_v61 = vpop.f32.mrb[2].mxu1 }
 0x3ca   :  { %v395_v62 = vadd.f32 %v514_v60, %v394_v61  ;;  %v580_v63 = vpop.f32.mrb[3].mxu1 }
 0x3cc   :  { %v398_v1 = vsub.f32 0.0, %v395_v62 }
 0x3ce   :  { %v399_v2 = vmul.f32 1.442695, %v398_v1 }
 0x3d0   :  { %638 = vpow2.f32 %v399_v2 }
 0x3da   :  { %v639_v0 = vpop.eup %638 }
 0x3db   :  { %v401_v3 = vadd.f32 1.0, %v639_v0 }
 0x3dd   :  { %640 = vrcp.f32 %v401_v3 }
 0x3e7   :  { %v641_v4 = vpop.eup %640 }
 0x3e8   :  { %v403_v5 = vmul.f32 %v641_v4, %v395_v62 }
 0x3ea   :  { %590 = vmatmul.mubr.msk.f32.vlgmr.msra.gmra.mrb[4].mxu0 %vm140_vm2, %v403_v5 }
 0x4bd   :  { %v484_v7 = vpop.f32.mrb[4].mxu0 }
 0x4be   :  { %v485_v8 = vadd.f32 %v516_v6, %v484_v7  ;;  %v591_v9 = vpop.f32.mrb[5].mxu0 }
 0x4c0   :  { %489 = vst.msk [vmem:[#allocation5] sm:$0xff] %vm488_vm3, %v485_v8 }
 0x4c1   :  { %675 = shalt.err (!%p672_p12)
}
 0x4c2   :  { %s676_s11 = scalar_lea.hbm %s816_s6, 128 }
 0x4c3   :  { %p677_p13 = scmp.ne.s32.totalorder %s816_s6, %s676_s11  ;;  %p680_p0 = scmp.lt.u32.totalorder %s676_s11, %s816_s6 }
 0x4c5   :  { %p682_p1 = pnand %p680_p0, %p677_p13 }
 0x4c7   :  { %685 = shalt.err (!%p682_p1)
}
 0x4c8   :  { %499 = dma.vmem_to_hbm [thread:$0]  %s497_s8, 128, %s816_s6, [#allocation4]  }
 0x4c9   :  { %688 = dma.done.wait [#allocation4], 128  }
 0x4ca   :  { %689 = vsyncadd [#allocation4], 4294967168 }
 0x4cb   :  { %503 = vsyncpa [#allocation3], 1 }
 0x4cc   :  { %504 = vsyncpa [#allocation4], 1 }

</bundles_post_ra>
